<compile_context>
chip_gen: v7x
topology: tpu7x:2x2x1
jax: 0.10.0
libtpu: 0.0.40
codegen_flags: <defaults>
</compile_context>

<pallas_src>
import numpy as np
import jax
import jax.numpy as jnp
from jax.experimental import pallas as pl
from jax.experimental.pallas import tpu as pltpu

T = 8      # diffusion steps (self.T)
B = 8      # batch size
D = 8      # channel_num = x.shape[1]  (task == 'MAX SUM RATE' -> out_dim == in_dim)
H = 32     # hidden width of the synthetic noise-prediction MLP (self.model)

# Row offsets inside the two packed VMEM buffers (all multiples of 8 sublanes).
# pack_a: lane width H            | pack_b: lane width D
A_W1Y = 0                          # (D, H)  loop-invariant first-layer weight
A_XWB = A_W1Y + D                  # (T*B, H) per-step activation bias table
A_ROWS = A_XWB + T * B             # = 72

B_Y0 = 0                           # (B, D)   y_T init
B_R = B_Y0 + B                     # (T*B, D) pre-broadcast r[i]
B_BT = B_R + T * B                 # (T*B, D) bt[i] = d[i]*noise[i] - cr[i]*b2
B_W2S = B_BT + T * B               # (T*H, D) W2s[i] = cr[i]*W2
B_ROWS = B_W2S + T * H             # = 392


def _diffusion_kernel(a_ref, b_ref, y_out_ref):
    # Hoisted loop-invariant weight (loaded once for all T steps).
    w1y = a_ref[A_W1Y:A_W1Y + D, :]                    # (D, H)
    y = b_ref[B_Y0:B_Y0 + B, :]                        # (B, D)  y_t init

    # Fully-unrolled in-kernel reverse-diffusion loop: step i = T-1, ..., 0.
    for i in range(T - 1, -1, -1):
        xwb_i = a_ref[A_XWB + i * B:A_XWB + (i + 1) * B, :]   # (B, H)
        r_i = b_ref[B_R + i * B:B_R + (i + 1) * B, :]         # (B, D)
        bt_i = b_ref[B_BT + i * B:B_BT + (i + 1) * B, :]      # (B, D)
        w2s_i = b_ref[B_W2S + i * H:B_W2S + (i + 1) * H, :]   # (H, D)

        # --- self.model(y_t, t, x_scaled): 2-layer MLP noise predictor ---
        h = jnp.tanh(jnp.dot(y, w1y, preferred_element_type=jnp.float32) + xwb_i)

        # --- custom_denoise, fully pre-folded ---
        # (y - c*est)*r + d*noise == r*y + (d*noise - cr*b2) - h@(cr*W2)
        ry = r_i * y + bt_i                 # independent of the MXU chain; overlaps
        y = ry - jnp.dot(h, w2s_i, preferred_element_type=jnp.float32)

        # 'MAX SUM RATE' clamping
        y = jnp.minimum(y, 1.0)             # == where(y > 1, 1, y)
        y = jnp.where(y < 0.0, 1e-5, y)     # keep exact reference semantics

        # global min-max normalization over the whole y_t tensor
        mn = jnp.min(y, keepdims=True)      # (1, 1)
        mx = jnp.max(y, keepdims=True)      # (1, 1)
        # NOTE: like the reference module, no eps guard on (mx - mn).
        y = (y - mn) * pl.reciprocal(mx - mn, approx=True)

    y_out_ref[...] = y


def diffusion_opt_forward(x, y0, noise_all, c, r, d, params):
    """x, y0: (B, D); noise_all: (T, B, D); c, r, d: (T,) schedule; params: MLP weights."""
    w1y, w1x, w1t, b1, w2, b2 = params
    f32 = jnp.float32

    # --- trace-time pre-folding of schedule / model constants ---
    cr = (c * r).astype(f32)                                        # (T,)
    dn = (d[:, None, None] * noise_all).astype(f32)                 # (T, B, D)
    dn = dn.at[0].set(0.0)                     # custom_denoise zeroes noise at step 0
    bt = dn - cr[:, None, None] * b2[None, :, :]                    # (T, B, D)
    w2s = cr[:, None, None] * w2[None, :, :]                        # (T, H, D)

    t_frac = (jnp.arange(T, dtype=f32) / float(T))[:, None]         # (T, 1)
    b1t = b1 + t_frac * w1t                                         # (T, H)
    xwb = (x @ w1x)[None, :, :] + b1t[:, None, :]                   # (T, B, H)

    r_blk = jnp.broadcast_to(r.astype(f32)[:, None, None], (T, B, D))

    # --- pack everything into two contiguous VMEM buffers ---
    pack_a = jnp.concatenate(
        [w1y.astype(f32), xwb.reshape(T * B, H).astype(f32)], axis=0)      # (72, H)
    pack_b = jnp.concatenate(
        [y0.astype(f32),
         r_blk.reshape(T * B, D),
         bt.reshape(T * B, D).astype(f32),
         w2s.reshape(T * H, D).astype(f32)], axis=0)                        # (392, D)

    vmem = lambda: pl.BlockSpec(memory_space=pltpu.MemorySpace.VMEM)

    return pl.pallas_call(
        _diffusion_kernel,
        out_shape=jax.ShapeDtypeStruct((B, D), jnp.float32),
        in_specs=[vmem(), vmem()],
        out_specs=vmem(),
    )(pack_a, pack_b)


def reference_forward(x, y0, noise_all, c, r, d, params):
    """Pure-JAX replica of DiffusionOpt.forward (MAX SUM RATE, debug=False)."""
    w1y, w1x, w1t, b1, w2, b2 = params
    y = y0
    for i in range(T - 1, -1, -1):
        tv = i / float(T)
        h = jnp.tanh(y @ w1y + x @ w1x + tv * w1t + b1)
        est = h @ w2 + b2
        y = (y - c[i] * est) * r[i]
        if i != 0:                                   # custom_denoise: zero noise at step 0
            y = y + d[i] * noise_all[i]
        y = jnp.where(y > 1.0, 1.0, y)
        y = jnp.where(y < 0.0, 1e-5, y)
        mn, mx = jnp.min(y), jnp.max(y)
        y = (y - mn) / (mx - mn)
    return y


if __name__ == "__main__":
    # --- deterministic diffusion schedule (alphas passed to __init__) ---
    betas_np = np.linspace(1e-4, 0.02, T).astype(np.float32)
    alphas_np = 1.0 - betas_np
    alphas_cumprod_np = np.cumprod(alphas_np).astype(np.float32)
    c_np = (4.0 * betas_np / np.sqrt(1.0 - alphas_cumprod_np)).astype(np.float32)
    r_np = np.sqrt(1.0 / alphas_np).astype(np.float32)
    prev_idx = np.maximum(np.arange(T) - 1, 0)
    d_np = ((1.0 - alphas_cumprod_np[prev_idx]) /
            (1.0 - alphas_cumprod_np)).astype(np.float32)
    c = jnp.asarray(c_np); r = jnp.asarray(r_np); d = jnp.asarray(d_np)

    # --- deterministic inputs / noise / model weights ---
    key = jax.random.PRNGKey(0)
    kx, ky0, kn, k1, k2, k3, k4, k5, k6 = jax.random.split(key, 9)

    x = jax.random.uniform(kx, (B, D), dtype=jnp.float32)                 # channel gains
    # custom_noise_sample(1, (B, D), enable_neg=False): dirichlet rows summing to 1
    y0 = jax.random.dirichlet(ky0, jnp.ones(D), shape=(B,)).astype(jnp.float32)
    # noise_single_sample(0, D) per row per step: dirichlet(3*ones) - 1/D, sum == 0
    noise_all = (jax.random.dirichlet(kn, 3.0 * jnp.ones(D), shape=(T, B))
                 - 1.0 / D).astype(jnp.float32)

    w1y = 0.1 * jax.random.normal(k1, (D, H), dtype=jnp.float32)
    w1x = 0.1 * jax.random.normal(k2, (D, H), dtype=jnp.float32)
    w1t = 0.1 * jax.random.normal(k3, (1, H), dtype=jnp.float32)
    b1 = 0.1 * jax.random.normal(k4, (1, H), dtype=jnp.float32)
    w2 = 0.1 * jax.random.normal(k5, (H, D), dtype=jnp.float32)
    b2 = 0.1 * jax.random.normal(k6, (1, D), dtype=jnp.float32)
    params = (w1y, w1x, w1t, b1, w2, b2)

    y_kernel = diffusion_opt_forward(x, y0, noise_all, c, r, d, params)
    y_kernel = jax.block_until_ready(y_kernel)

    y_ref = jax.block_until_ready(reference_forward(x, y0, noise_all, c, r, d, params))
    np.testing.assert_allclose(np.asarray(y_kernel), np.asarray(y_ref),
                               rtol=2e-2, atol=2e-2)
    print("KERNEL_OK")
</pallas_src>

<mosaic_0001>
module attributes {stable_mosaic.version = 11 : i64} {
  func.func @_diffusion_kernel(%arg0: memref<72x32xf32, #tpu.memory_space<vmem>>, %arg1: memref<392x8xf32, #tpu.memory_space<vmem>>, %arg2: memref<8x8xf32, #tpu.memory_space<vmem>>) attributes {dimension_semantics = [], scalar_prefetch = 0 : i64, scratch_operands = 0 : i64, tpu.core_type = #tpu.core_type<tc>} {
    %c0 = arith.constant 0 : index
    %c0_0 = arith.constant 0 : index
    %0 = vector.load %arg0[%c0, %c0_0] : memref<72x32xf32, #tpu.memory_space<vmem>>, vector<8x32xf32>
    %c0_1 = arith.constant 0 : index
    %c0_2 = arith.constant 0 : index
    %1 = vector.load %arg1[%c0_1, %c0_2] : memref<392x8xf32, #tpu.memory_space<vmem>>, vector<8x8xf32>
    %c64 = arith.constant 64 : index
    %c0_3 = arith.constant 0 : index
    %2 = vector.load %arg0[%c64, %c0_3] : memref<72x32xf32, #tpu.memory_space<vmem>>, vector<8x32xf32>
    %c64_4 = arith.constant 64 : index
    %c0_5 = arith.constant 0 : index
    %3 = vector.load %arg1[%c64_4, %c0_5] : memref<392x8xf32, #tpu.memory_space<vmem>>, vector<8x8xf32>
    %c128 = arith.constant 128 : index
    %c0_6 = arith.constant 0 : index
    %4 = vector.load %arg1[%c128, %c0_6] : memref<392x8xf32, #tpu.memory_space<vmem>>, vector<8x8xf32>
    %c360 = arith.constant 360 : index
    %c0_7 = arith.constant 0 : index
    %5 = vector.load %arg1[%c360, %c0_7] : memref<392x8xf32, #tpu.memory_space<vmem>>, vector<32x8xf32>
    %cst = arith.constant dense<0.000000e+00> : vector<8x32xf32>
    %6 = tpu.matmul %1, %0, %cst {dimension_numbers = #tpu.dot_dimension_numbers<[1], [0], [0], [1], [0, 0, 1, 1], [], []>} : vector<8x8xf32>, vector<8x32xf32>, vector<8x32xf32> -> vector<8x32xf32>
    %7 = arith.addf %6, %2 : vector<8x32xf32>
    %8 = math.tanh %7 : vector<8x32xf32>
    %9 = arith.mulf %3, %1 : vector<8x8xf32>
    %10 = arith.addf %9, %4 : vector<8x8xf32>
    %cst_8 = arith.constant dense<0.000000e+00> : vector<8x8xf32>
    %11 = tpu.matmul %8, %5, %cst_8 {dimension_numbers = #tpu.dot_dimension_numbers<[1], [0], [0], [1], [0, 0, 1, 1], [], []>} : vector<8x32xf32>, vector<32x8xf32>, vector<8x8xf32> -> vector<8x8xf32>
    %12 = arith.subf %10, %11 : vector<8x8xf32>
    %cst_9 = arith.constant 1.000000e+00 : f32
    %13 = vector.broadcast %cst_9 : f32 to vector<8x8xf32>
    %14 = arith.minimumf %12, %13 : vector<8x8xf32>
    %cst_10 = arith.constant 0.000000e+00 : f32
    %15 = vector.broadcast %cst_10 : f32 to vector<8x8xf32>
    %16 = arith.cmpf olt, %14, %15 : vector<8x8xf32>
    %cst_11 = arith.constant 9.99999974E-6 : f32
    %17 = vector.broadcast %cst_11 : f32 to vector<8x8xf32>
    %18 = arith.select %16, %17, %14 : vector<8x8xi1>, vector<8x8xf32>
    %19 = vector.shape_cast %18 : vector<8x8xf32> to vector<1x8x8xf32>
    %cst_12 = arith.constant dense<0x7F800000> : vector<1xf32>
    %20 = vector.multi_reduction <minimumf>, %19, %cst_12 [1, 2] : vector<1x8x8xf32> to vector<1xf32>
    %21 = vector.shape_cast %20 : vector<1xf32> to vector<1x1x1xf32>
    %22 = vector.extract %21[0, 0, 0] : f32 from vector<1x1x1xf32>
    %23 = vector.broadcast %22 : f32 to vector<1x1xf32>
    %24 = vector.shape_cast %18 : vector<8x8xf32> to vector<1x8x8xf32>
    %cst_13 = arith.constant dense<0xFF800000> : vector<1xf32>
    %25 = vector.multi_reduction <maximumf>, %24, %cst_13 [1, 2] : vector<1x8x8xf32> to vector<1xf32>
    %26 = vector.shape_cast %25 : vector<1xf32> to vector<1x1x1xf32>
    %27 = vector.extract %26[0, 0, 0] : f32 from vector<1x1x1xf32>
    %28 = vector.broadcast %27 : f32 to vector<1x1xf32>
    %29 = vector.broadcast %23 : vector<1x1xf32> to vector<8x8xf32>
    %30 = arith.subf %18, %29 : vector<8x8xf32>
    %31 = arith.subf %28, %23 : vector<1x1xf32>
    %32 = tpu.reciprocal %31 {approx = true} : vector<1x1xf32> -> vector<1x1xf32>
    %33 = vector.broadcast %32 : vector<1x1xf32> to vector<8x8xf32>
    %34 = arith.mulf %30, %33 : vector<8x8xf32>
    %c56 = arith.constant 56 : index
    %c0_14 = arith.constant 0 : index
    %35 = vector.load %arg0[%c56, %c0_14] : memref<72x32xf32, #tpu.memory_space<vmem>>, vector<8x32xf32>
    %c56_15 = arith.constant 56 : index
    %c0_16 = arith.constant 0 : index
    %36 = vector.load %arg1[%c56_15, %c0_16] : memref<392x8xf32, #tpu.memory_space<vmem>>, vector<8x8xf32>
    %c120 = arith.constant 120 : index
    %c0_17 = arith.constant 0 : index
    %37 = vector.load %arg1[%c120, %c0_17] : memref<392x8xf32, #tpu.memory_space<vmem>>, vector<8x8xf32>
    %c328 = arith.constant 328 : index
    %c0_18 = arith.constant 0 : index
    %38 = vector.load %arg1[%c328, %c0_18] : memref<392x8xf32, #tpu.memory_space<vmem>>, vector<32x8xf32>
    %cst_19 = arith.constant dense<0.000000e+00> : vector<8x32xf32>
    %39 = tpu.matmul %34, %0, %cst_19 {dimension_numbers = #tpu.dot_dimension_numbers<[1], [0], [0], [1], [0, 0, 1, 1], [], []>} : vector<8x8xf32>, vector<8x32xf32>, vector<8x32xf32> -> vector<8x32xf32>
    %40 = arith.addf %39, %35 : vector<8x32xf32>
    %41 = math.tanh %40 : vector<8x32xf32>
    %42 = arith.mulf %36, %34 : vector<8x8xf32>
    %43 = arith.addf %42, %37 : vector<8x8xf32>
    %cst_20 = arith.constant dense<0.000000e+00> : vector<8x8xf32>
    %44 = tpu.matmul %41, %38, %cst_20 {dimension_numbers = #tpu.dot_dimension_numbers<[1], [0], [0], [1], [0, 0, 1, 1], [], []>} : vector<8x32xf32>, vector<32x8xf32>, vector<8x8xf32> -> vector<8x8xf32>
    %45 = arith.subf %43, %44 : vector<8x8xf32>
    %cst_21 = arith.constant 1.000000e+00 : f32
    %46 = vector.broadcast %cst_21 : f32 to vector<8x8xf32>
    %47 = arith.minimumf %45, %46 : vector<8x8xf32>
    %cst_22 = arith.constant 0.000000e+00 : f32
    %48 = vector.broadcast %cst_22 : f32 to vector<8x8xf32>
    %49 = arith.cmpf olt, %47, %48 : vector<8x8xf32>
    %cst_23 = arith.constant 9.99999974E-6 : f32
    %50 = vector.broadcast %cst_23 : f32 to vector<8x8xf32>
    %51 = arith.select %49, %50, %47 : vector<8x8xi1>, vector<8x8xf32>
    %52 = vector.shape_cast %51 : vector<8x8xf32> to vector<1x8x8xf32>
    %cst_24 = arith.constant dense<0x7F800000> : vector<1xf32>
    %53 = vector.multi_reduction <minimumf>, %52, %cst_24 [1, 2] : vector<1x8x8xf32> to vector<1xf32>
    %54 = vector.shape_cast %53 : vector<1xf32> to vector<1x1x1xf32>
    %55 = vector.extract %54[0, 0, 0] : f32 from vector<1x1x1xf32>
    %56 = vector.broadcast %55 : f32 to vector<1x1xf32>
    %57 = vector.shape_cast %51 : vector<8x8xf32> to vector<1x8x8xf32>
    %cst_25 = arith.constant dense<0xFF800000> : vector<1xf32>
    %58 = vector.multi_reduction <maximumf>, %57, %cst_25 [1, 2] : vector<1x8x8xf32> to vector<1xf32>
    %59 = vector.shape_cast %58 : vector<1xf32> to vector<1x1x1xf32>
    %60 = vector.extract %59[0, 0, 0] : f32 from vector<1x1x1xf32>
    %61 = vector.broadcast %60 : f32 to vector<1x1xf32>
    %62 = vector.broadcast %56 : vector<1x1xf32> to vector<8x8xf32>
    %63 = arith.subf %51, %62 : vector<8x8xf32>
    %64 = arith.subf %61, %56 : vector<1x1xf32>
    %65 = tpu.reciprocal %64 {approx = true} : vector<1x1xf32> -> vector<1x1xf32>
    %66 = vector.broadcast %65 : vector<1x1xf32> to vector<8x8xf32>
    %67 = arith.mulf %63, %66 : vector<8x8xf32>
    %c48 = arith.constant 48 : index
    %c0_26 = arith.constant 0 : index
    %68 = vector.load %arg0[%c48, %c0_26] : memref<72x32xf32, #tpu.memory_space<vmem>>, vector<8x32xf32>
    %c48_27 = arith.constant 48 : index
    %c0_28 = arith.constant 0 : index
    %69 = vector.load %arg1[%c48_27, %c0_28] : memref<392x8xf32, #tpu.memory_space<vmem>>, vector<8x8xf32>
    %c112 = arith.constant 112 : index
    %c0_29 = arith.constant 0 : index
    %70 = vector.load %arg1[%c112, %c0_29] : memref<392x8xf32, #tpu.memory_space<vmem>>, vector<8x8xf32>
    %c296 = arith.constant 296 : index
    %c0_30 = arith.constant 0 : index
    %71 = vector.load %arg1[%c296, %c0_30] : memref<392x8xf32, #tpu.memory_space<vmem>>, vector<32x8xf32>
    %cst_31 = arith.constant dense<0.000000e+00> : vector<8x32xf32>
    %72 = tpu.matmul %67, %0, %cst_31 {dimension_numbers = #tpu.dot_dimension_numbers<[1], [0], [0], [1], [0, 0, 1, 1], [], []>} : vector<8x8xf32>, vector<8x32xf32>, vector<8x32xf32> -> vector<8x32xf32>
    %73 = arith.addf %72, %68 : vector<8x32xf32>
    %74 = math.tanh %73 : vector<8x32xf32>
    %75 = arith.mulf %69, %67 : vector<8x8xf32>
    %76 = arith.addf %75, %70 : vector<8x8xf32>
    %cst_32 = arith.constant dense<0.000000e+00> : vector<8x8xf32>
    %77 = tpu.matmul %74, %71, %cst_32 {dimension_numbers = #tpu.dot_dimension_numbers<[1], [0], [0], [1], [0, 0, 1, 1], [], []>} : vector<8x32xf32>, vector<32x8xf32>, vector<8x8xf32> -> vector<8x8xf32>
    %78 = arith.subf %76, %77 : vector<8x8xf32>
    %cst_33 = arith.constant 1.000000e+00 : f32
    %79 = vector.broadcast %cst_33 : f32 to vector<8x8xf32>
    %80 = arith.minimumf %78, %79 : vector<8x8xf32>
    %cst_34 = arith.constant 0.000000e+00 : f32
    %81 = vector.broadcast %cst_34 : f32 to vector<8x8xf32>
    %82 = arith.cmpf olt, %80, %81 : vector<8x8xf32>
    %cst_35 = arith.constant 9.99999974E-6 : f32
    %83 = vector.broadcast %cst_35 : f32 to vector<8x8xf32>
    %84 = arith.select %82, %83, %80 : vector<8x8xi1>, vector<8x8xf32>
    %85 = vector.shape_cast %84 : vector<8x8xf32> to vector<1x8x8xf32>
    %cst_36 = arith.constant dense<0x7F800000> : vector<1xf32>
    %86 = vector.multi_reduction <minimumf>, %85, %cst_36 [1, 2] : vector<1x8x8xf32> to vector<1xf32>
    %87 = vector.shape_cast %86 : vector<1xf32> to vector<1x1x1xf32>
    %88 = vector.extract %87[0, 0, 0] : f32 from vector<1x1x1xf32>
    %89 = vector.broadcast %88 : f32 to vector<1x1xf32>
    %90 = vector.shape_cast %84 : vector<8x8xf32> to vector<1x8x8xf32>
    %cst_37 = arith.constant dense<0xFF800000> : vector<1xf32>
    %91 = vector.multi_reduction <maximumf>, %90, %cst_37 [1, 2] : vector<1x8x8xf32> to vector<1xf32>
    %92 = vector.shape_cast %91 : vector<1xf32> to vector<1x1x1xf32>
    %93 = vector.extract %92[0, 0, 0] : f32 from vector<1x1x1xf32>
    %94 = vector.broadcast %93 : f32 to vector<1x1xf32>
    %95 = vector.broadcast %89 : vector<1x1xf32> to vector<8x8xf32>
    %96 = arith.subf %84, %95 : vector<8x8xf32>
    %97 = arith.subf %94, %89 : vector<1x1xf32>
    %98 = tpu.reciprocal %97 {approx = true} : vector<1x1xf32> -> vector<1x1xf32>
    %99 = vector.broadcast %98 : vector<1x1xf32> to vector<8x8xf32>
    %100 = arith.mulf %96, %99 : vector<8x8xf32>
    %c40 = arith.constant 40 : index
    %c0_38 = arith.constant 0 : index
    %101 = vector.load %arg0[%c40, %c0_38] : memref<72x32xf32, #tpu.memory_space<vmem>>, vector<8x32xf32>
    %c40_39 = arith.constant 40 : index
    %c0_40 = arith.constant 0 : index
    %102 = vector.load %arg1[%c40_39, %c0_40] : memref<392x8xf32, #tpu.memory_space<vmem>>, vector<8x8xf32>
    %c104 = arith.constant 104 : index
    %c0_41 = arith.constant 0 : index
    %103 = vector.load %arg1[%c104, %c0_41] : memref<392x8xf32, #tpu.memory_space<vmem>>, vector<8x8xf32>
    %c264 = arith.constant 264 : index
    %c0_42 = arith.constant 0 : index
    %104 = vector.load %arg1[%c264, %c0_42] : memref<392x8xf32, #tpu.memory_space<vmem>>, vector<32x8xf32>
    %cst_43 = arith.constant dense<0.000000e+00> : vector<8x32xf32>
    %105 = tpu.matmul %100, %0, %cst_43 {dimension_numbers = #tpu.dot_dimension_numbers<[1], [0], [0], [1], [0, 0, 1, 1], [], []>} : vector<8x8xf32>, vector<8x32xf32>, vector<8x32xf32> -> vector<8x32xf32>
    %106 = arith.addf %105, %101 : vector<8x32xf32>
    %107 = math.tanh %106 : vector<8x32xf32>
    %108 = arith.mulf %102, %100 : vector<8x8xf32>
    %109 = arith.addf %108, %103 : vector<8x8xf32>
    %cst_44 = arith.constant dense<0.000000e+00> : vector<8x8xf32>
    %110 = tpu.matmul %107, %104, %cst_44 {dimension_numbers = #tpu.dot_dimension_numbers<[1], [0], [0], [1], [0, 0, 1, 1], [], []>} : vector<8x32xf32>, vector<32x8xf32>, vector<8x8xf32> -> vector<8x8xf32>
    %111 = arith.subf %109, %110 : vector<8x8xf32>
    %cst_45 = arith.constant 1.000000e+00 : f32
    %112 = vector.broadcast %cst_45 : f32 to vector<8x8xf32>
    %113 = arith.minimumf %111, %112 : vector<8x8xf32>
    %cst_46 = arith.constant 0.000000e+00 : f32
    %114 = vector.broadcast %cst_46 : f32 to vector<8x8xf32>
    %115 = arith.cmpf olt, %113, %114 : vector<8x8xf32>
    %cst_47 = arith.constant 9.99999974E-6 : f32
    %116 = vector.broadcast %cst_47 : f32 to vector<8x8xf32>
    %117 = arith.select %115, %116, %113 : vector<8x8xi1>, vector<8x8xf32>
    %118 = vector.shape_cast %117 : vector<8x8xf32> to vector<1x8x8xf32>
    %cst_48 = arith.constant dense<0x7F800000> : vector<1xf32>
    %119 = vector.multi_reduction <minimumf>, %118, %cst_48 [1, 2] : vector<1x8x8xf32> to vector<1xf32>
    %120 = vector.shape_cast %119 : vector<1xf32> to vector<1x1x1xf32>
    %121 = vector.extract %120[0, 0, 0] : f32 from vector<1x1x1xf32>
    %122 = vector.broadcast %121 : f32 to vector<1x1xf32>
    %123 = vector.shape_cast %117 : vector<8x8xf32> to vector<1x8x8xf32>
    %cst_49 = arith.constant dense<0xFF800000> : vector<1xf32>
    %124 = vector.multi_reduction <maximumf>, %123, %cst_49 [1, 2] : vector<1x8x8xf32> to vector<1xf32>
    %125 = vector.shape_cast %124 : vector<1xf32> to vector<1x1x1xf32>
    %126 = vector.extract %125[0, 0, 0] : f32 from vector<1x1x1xf32>
    %127 = vector.broadcast %126 : f32 to vector<1x1xf32>
    %128 = vector.broadcast %122 : vector<1x1xf32> to vector<8x8xf32>
    %129 = arith.subf %117, %128 : vector<8x8xf32>
    %130 = arith.subf %127, %122 : vector<1x1xf32>
    %131 = tpu.reciprocal %130 {approx = true} : vector<1x1xf32> -> vector<1x1xf32>
    %132 = vector.broadcast %131 : vector<1x1xf32> to vector<8x8xf32>
    %133 = arith.mulf %129, %132 : vector<8x8xf32>
    %c32 = arith.constant 32 : index
    %c0_50 = arith.constant 0 : index
    %134 = vector.load %arg0[%c32, %c0_50] : memref<72x32xf32, #tpu.memory_space<vmem>>, vector<8x32xf32>
    %c32_51 = arith.constant 32 : index
    %c0_52 = arith.constant 0 : index
    %135 = vector.load %arg1[%c32_51, %c0_52] : memref<392x8xf32, #tpu.memory_space<vmem>>, vector<8x8xf32>
    %c96 = arith.constant 96 : index
    %c0_53 = arith.constant 0 : index
    %136 = vector.load %arg1[%c96, %c0_53] : memref<392x8xf32, #tpu.memory_space<vmem>>, vector<8x8xf32>
    %c232 = arith.constant 232 : index
    %c0_54 = arith.constant 0 : index
    %137 = vector.load %arg1[%c232, %c0_54] : memref<392x8xf32, #tpu.memory_space<vmem>>, vector<32x8xf32>
    %cst_55 = arith.constant dense<0.000000e+00> : vector<8x32xf32>
    %138 = tpu.matmul %133, %0, %cst_55 {dimension_numbers = #tpu.dot_dimension_numbers<[1], [0], [0], [1], [0, 0, 1, 1], [], []>} : vector<8x8xf32>, vector<8x32xf32>, vector<8x32xf32> -> vector<8x32xf32>
    %139 = arith.addf %138, %134 : vector<8x32xf32>
    %140 = math.tanh %139 : vector<8x32xf32>
    %141 = arith.mulf %135, %133 : vector<8x8xf32>
    %142 = arith.addf %141, %136 : vector<8x8xf32>
    %cst_56 = arith.constant dense<0.000000e+00> : vector<8x8xf32>
    %143 = tpu.matmul %140, %137, %cst_56 {dimension_numbers = #tpu.dot_dimension_numbers<[1], [0], [0], [1], [0, 0, 1, 1], [], []>} : vector<8x32xf32>, vector<32x8xf32>, vector<8x8xf32> -> vector<8x8xf32>
    %144 = arith.subf %142, %143 : vector<8x8xf32>
    %cst_57 = arith.constant 1.000000e+00 : f32
    %145 = vector.broadcast %cst_57 : f32 to vector<8x8xf32>
    %146 = arith.minimumf %144, %145 : vector<8x8xf32>
    %cst_58 = arith.constant 0.000000e+00 : f32
    %147 = vector.broadcast %cst_58 : f32 to vector<8x8xf32>
    %148 = arith.cmpf olt, %146, %147 : vector<8x8xf32>
    %cst_59 = arith.constant 9.99999974E-6 : f32
    %149 = vector.broadcast %cst_59 : f32 to vector<8x8xf32>
    %150 = arith.select %148, %149, %146 : vector<8x8xi1>, vector<8x8xf32>
    %151 = vector.shape_cast %150 : vector<8x8xf32> to vector<1x8x8xf32>
    %cst_60 = arith.constant dense<0x7F800000> : vector<1xf32>
    %152 = vector.multi_reduction <minimumf>, %151, %cst_60 [1, 2] : vector<1x8x8xf32> to vector<1xf32>
    %153 = vector.shape_cast %152 : vector<1xf32> to vector<1x1x1xf32>
    %154 = vector.extract %153[0, 0, 0] : f32 from vector<1x1x1xf32>
    %155 = vector.broadcast %154 : f32 to vector<1x1xf32>
    %156 = vector.shape_cast %150 : vector<8x8xf32> to vector<1x8x8xf32>
    %cst_61 = arith.constant dense<0xFF800000> : vector<1xf32>
    %157 = vector.multi_reduction <maximumf>, %156, %cst_61 [1, 2] : vector<1x8x8xf32> to vector<1xf32>
    %158 = vector.shape_cast %157 : vector<1xf32> to vector<1x1x1xf32>
    %159 = vector.extract %158[0, 0, 0] : f32 from vector<1x1x1xf32>
    %160 = vector.broadcast %159 : f32 to vector<1x1xf32>
    %161 = vector.broadcast %155 : vector<1x1xf32> to vector<8x8xf32>
    %162 = arith.subf %150, %161 : vector<8x8xf32>
    %163 = arith.subf %160, %155 : vector<1x1xf32>
    %164 = tpu.reciprocal %163 {approx = true} : vector<1x1xf32> -> vector<1x1xf32>
    %165 = vector.broadcast %164 : vector<1x1xf32> to vector<8x8xf32>
    %166 = arith.mulf %162, %165 : vector<8x8xf32>
    %c24 = arith.constant 24 : index
    %c0_62 = arith.constant 0 : index
    %167 = vector.load %arg0[%c24, %c0_62] : memref<72x32xf32, #tpu.memory_space<vmem>>, vector<8x32xf32>
    %c24_63 = arith.constant 24 : index
    %c0_64 = arith.constant 0 : index
    %168 = vector.load %arg1[%c24_63, %c0_64] : memref<392x8xf32, #tpu.memory_space<vmem>>, vector<8x8xf32>
    %c88 = arith.constant 88 : index
    %c0_65 = arith.constant 0 : index
    %169 = vector.load %arg1[%c88, %c0_65] : memref<392x8xf32, #tpu.memory_space<vmem>>, vector<8x8xf32>
    %c200 = arith.constant 200 : index
    %c0_66 = arith.constant 0 : index
    %170 = vector.load %arg1[%c200, %c0_66] : memref<392x8xf32, #tpu.memory_space<vmem>>, vector<32x8xf32>
    %cst_67 = arith.constant dense<0.000000e+00> : vector<8x32xf32>
    %171 = tpu.matmul %166, %0, %cst_67 {dimension_numbers = #tpu.dot_dimension_numbers<[1], [0], [0], [1], [0, 0, 1, 1], [], []>} : vector<8x8xf32>, vector<8x32xf32>, vector<8x32xf32> -> vector<8x32xf32>
    %172 = arith.addf %171, %167 : vector<8x32xf32>
    %173 = math.tanh %172 : vector<8x32xf32>
    %174 = arith.mulf %168, %166 : vector<8x8xf32>
    %175 = arith.addf %174, %169 : vector<8x8xf32>
    %cst_68 = arith.constant dense<0.000000e+00> : vector<8x8xf32>
    %176 = tpu.matmul %173, %170, %cst_68 {dimension_numbers = #tpu.dot_dimension_numbers<[1], [0], [0], [1], [0, 0, 1, 1], [], []>} : vector<8x32xf32>, vector<32x8xf32>, vector<8x8xf32> -> vector<8x8xf32>
    %177 = arith.subf %175, %176 : vector<8x8xf32>
    %cst_69 = arith.constant 1.000000e+00 : f32
    %178 = vector.broadcast %cst_69 : f32 to vector<8x8xf32>
    %179 = arith.minimumf %177, %178 : vector<8x8xf32>
    %cst_70 = arith.constant 0.000000e+00 : f32
    %180 = vector.broadcast %cst_70 : f32 to vector<8x8xf32>
    %181 = arith.cmpf olt, %179, %180 : vector<8x8xf32>
    %cst_71 = arith.constant 9.99999974E-6 : f32
    %182 = vector.broadcast %cst_71 : f32 to vector<8x8xf32>
    %183 = arith.select %181, %182, %179 : vector<8x8xi1>, vector<8x8xf32>
    %184 = vector.shape_cast %183 : vector<8x8xf32> to vector<1x8x8xf32>
    %cst_72 = arith.constant dense<0x7F800000> : vector<1xf32>
    %185 = vector.multi_reduction <minimumf>, %184, %cst_72 [1, 2] : vector<1x8x8xf32> to vector<1xf32>
    %186 = vector.shape_cast %185 : vector<1xf32> to vector<1x1x1xf32>
    %187 = vector.extract %186[0, 0, 0] : f32 from vector<1x1x1xf32>
    %188 = vector.broadcast %187 : f32 to vector<1x1xf32>
    %189 = vector.shape_cast %183 : vector<8x8xf32> to vector<1x8x8xf32>
    %cst_73 = arith.constant dense<0xFF800000> : vector<1xf32>
    %190 = vector.multi_reduction <maximumf>, %189, %cst_73 [1, 2] : vector<1x8x8xf32> to vector<1xf32>
    %191 = vector.shape_cast %190 : vector<1xf32> to vector<1x1x1xf32>
    %192 = vector.extract %191[0, 0, 0] : f32 from vector<1x1x1xf32>
    %193 = vector.broadcast %192 : f32 to vector<1x1xf32>
    %194 = vector.broadcast %188 : vector<1x1xf32> to vector<8x8xf32>
    %195 = arith.subf %183, %194 : vector<8x8xf32>
    %196 = arith.subf %193, %188 : vector<1x1xf32>
    %197 = tpu.reciprocal %196 {approx = true} : vector<1x1xf32> -> vector<1x1xf32>
    %198 = vector.broadcast %197 : vector<1x1xf32> to vector<8x8xf32>
    %199 = arith.mulf %195, %198 : vector<8x8xf32>
    %c16 = arith.constant 16 : index
    %c0_74 = arith.constant 0 : index
    %200 = vector.load %arg0[%c16, %c0_74] : memref<72x32xf32, #tpu.memory_space<vmem>>, vector<8x32xf32>
    %c16_75 = arith.constant 16 : index
    %c0_76 = arith.constant 0 : index
    %201 = vector.load %arg1[%c16_75, %c0_76] : memref<392x8xf32, #tpu.memory_space<vmem>>, vector<8x8xf32>
    %c80 = arith.constant 80 : index
    %c0_77 = arith.constant 0 : index
    %202 = vector.load %arg1[%c80, %c0_77] : memref<392x8xf32, #tpu.memory_space<vmem>>, vector<8x8xf32>
    %c168 = arith.constant 168 : index
    %c0_78 = arith.constant 0 : index
    %203 = vector.load %arg1[%c168, %c0_78] : memref<392x8xf32, #tpu.memory_space<vmem>>, vector<32x8xf32>
    %cst_79 = arith.constant dense<0.000000e+00> : vector<8x32xf32>
    %204 = tpu.matmul %199, %0, %cst_79 {dimension_numbers = #tpu.dot_dimension_numbers<[1], [0], [0], [1], [0, 0, 1, 1], [], []>} : vector<8x8xf32>, vector<8x32xf32>, vector<8x32xf32> -> vector<8x32xf32>
    %205 = arith.addf %204, %200 : vector<8x32xf32>
    %206 = math.tanh %205 : vector<8x32xf32>
    %207 = arith.mulf %201, %199 : vector<8x8xf32>
    %208 = arith.addf %207, %202 : vector<8x8xf32>
    %cst_80 = arith.constant dense<0.000000e+00> : vector<8x8xf32>
    %209 = tpu.matmul %206, %203, %cst_80 {dimension_numbers = #tpu.dot_dimension_numbers<[1], [0], [0], [1], [0, 0, 1, 1], [], []>} : vector<8x32xf32>, vector<32x8xf32>, vector<8x8xf32> -> vector<8x8xf32>
    %210 = arith.subf %208, %209 : vector<8x8xf32>
    %cst_81 = arith.constant 1.000000e+00 : f32
    %211 = vector.broadcast %cst_81 : f32 to vector<8x8xf32>
    %212 = arith.minimumf %210, %211 : vector<8x8xf32>
    %cst_82 = arith.constant 0.000000e+00 : f32
    %213 = vector.broadcast %cst_82 : f32 to vector<8x8xf32>
    %214 = arith.cmpf olt, %212, %213 : vector<8x8xf32>
    %cst_83 = arith.constant 9.99999974E-6 : f32
    %215 = vector.broadcast %cst_83 : f32 to vector<8x8xf32>
    %216 = arith.select %214, %215, %212 : vector<8x8xi1>, vector<8x8xf32>
    %217 = vector.shape_cast %216 : vector<8x8xf32> to vector<1x8x8xf32>
    %cst_84 = arith.constant dense<0x7F800000> : vector<1xf32>
    %218 = vector.multi_reduction <minimumf>, %217, %cst_84 [1, 2] : vector<1x8x8xf32> to vector<1xf32>
    %219 = vector.shape_cast %218 : vector<1xf32> to vector<1x1x1xf32>
    %220 = vector.extract %219[0, 0, 0] : f32 from vector<1x1x1xf32>
    %221 = vector.broadcast %220 : f32 to vector<1x1xf32>
    %222 = vector.shape_cast %216 : vector<8x8xf32> to vector<1x8x8xf32>
    %cst_85 = arith.constant dense<0xFF800000> : vector<1xf32>
    %223 = vector.multi_reduction <maximumf>, %222, %cst_85 [1, 2] : vector<1x8x8xf32> to vector<1xf32>
    %224 = vector.shape_cast %223 : vector<1xf32> to vector<1x1x1xf32>
    %225 = vector.extract %224[0, 0, 0] : f32 from vector<1x1x1xf32>
    %226 = vector.broadcast %225 : f32 to vector<1x1xf32>
    %227 = vector.broadcast %221 : vector<1x1xf32> to vector<8x8xf32>
    %228 = arith.subf %216, %227 : vector<8x8xf32>
    %229 = arith.subf %226, %221 : vector<1x1xf32>
    %230 = tpu.reciprocal %229 {approx = true} : vector<1x1xf32> -> vector<1x1xf32>
    %231 = vector.broadcast %230 : vector<1x1xf32> to vector<8x8xf32>
    %232 = arith.mulf %228, %231 : vector<8x8xf32>
    %c8 = arith.constant 8 : index
    %c0_86 = arith.constant 0 : index
    %233 = vector.load %arg0[%c8, %c0_86] : memref<72x32xf32, #tpu.memory_space<vmem>>, vector<8x32xf32>
    %c8_87 = arith.constant 8 : index
    %c0_88 = arith.constant 0 : index
    %234 = vector.load %arg1[%c8_87, %c0_88] : memref<392x8xf32, #tpu.memory_space<vmem>>, vector<8x8xf32>
    %c72 = arith.constant 72 : index
    %c0_89 = arith.constant 0 : index
    %235 = vector.load %arg1[%c72, %c0_89] : memref<392x8xf32, #tpu.memory_space<vmem>>, vector<8x8xf32>
    %c136 = arith.constant 136 : index
    %c0_90 = arith.constant 0 : index
    %236 = vector.load %arg1[%c136, %c0_90] : memref<392x8xf32, #tpu.memory_space<vmem>>, vector<32x8xf32>
    %cst_91 = arith.constant dense<0.000000e+00> : vector<8x32xf32>
    %237 = tpu.matmul %232, %0, %cst_91 {dimension_numbers = #tpu.dot_dimension_numbers<[1], [0], [0], [1], [0, 0, 1, 1], [], []>} : vector<8x8xf32>, vector<8x32xf32>, vector<8x32xf32> -> vector<8x32xf32>
    %238 = arith.addf %237, %233 : vector<8x32xf32>
    %239 = math.tanh %238 : vector<8x32xf32>
    %240 = arith.mulf %234, %232 : vector<8x8xf32>
    %241 = arith.addf %240, %235 : vector<8x8xf32>
    %cst_92 = arith.constant dense<0.000000e+00> : vector<8x8xf32>
    %242 = tpu.matmul %239, %236, %cst_92 {dimension_numbers = #tpu.dot_dimension_numbers<[1], [0], [0], [1], [0, 0, 1, 1], [], []>} : vector<8x32xf32>, vector<32x8xf32>, vector<8x8xf32> -> vector<8x8xf32>
    %243 = arith.subf %241, %242 : vector<8x8xf32>
    %cst_93 = arith.constant 1.000000e+00 : f32
    %244 = vector.broadcast %cst_93 : f32 to vector<8x8xf32>
    %245 = arith.minimumf %243, %244 : vector<8x8xf32>
    %cst_94 = arith.constant 0.000000e+00 : f32
    %246 = vector.broadcast %cst_94 : f32 to vector<8x8xf32>
    %247 = arith.cmpf olt, %245, %246 : vector<8x8xf32>
    %cst_95 = arith.constant 9.99999974E-6 : f32
    %248 = vector.broadcast %cst_95 : f32 to vector<8x8xf32>
    %249 = arith.select %247, %248, %245 : vector<8x8xi1>, vector<8x8xf32>
    %250 = vector.shape_cast %249 : vector<8x8xf32> to vector<1x8x8xf32>
    %cst_96 = arith.constant dense<0x7F800000> : vector<1xf32>
    %251 = vector.multi_reduction <minimumf>, %250, %cst_96 [1, 2] : vector<1x8x8xf32> to vector<1xf32>
    %252 = vector.shape_cast %251 : vector<1xf32> to vector<1x1x1xf32>
    %253 = vector.extract %252[0, 0, 0] : f32 from vector<1x1x1xf32>
    %254 = vector.broadcast %253 : f32 to vector<1x1xf32>
    %255 = vector.shape_cast %249 : vector<8x8xf32> to vector<1x8x8xf32>
    %cst_97 = arith.constant dense<0xFF800000> : vector<1xf32>
    %256 = vector.multi_reduction <maximumf>, %255, %cst_97 [1, 2] : vector<1x8x8xf32> to vector<1xf32>
    %257 = vector.shape_cast %256 : vector<1xf32> to vector<1x1x1xf32>
    %258 = vector.extract %257[0, 0, 0] : f32 from vector<1x1x1xf32>
    %259 = vector.broadcast %258 : f32 to vector<1x1xf32>
    %260 = vector.broadcast %254 : vector<1x1xf32> to vector<8x8xf32>
    %261 = arith.subf %249, %260 : vector<8x8xf32>
    %262 = arith.subf %259, %254 : vector<1x1xf32>
    %263 = tpu.reciprocal %262 {approx = true} : vector<1x1xf32> -> vector<1x1xf32>
    %264 = vector.broadcast %263 : vector<1x1xf32> to vector<8x8xf32>
    %265 = arith.mulf %261, %264 : vector<8x8xf32>
    %c0_98 = arith.constant 0 : index
    %c0_99 = arith.constant 0 : index
    %266 = vector.load %arg2[%c0_98, %c0_99] : memref<8x8xf32, #tpu.memory_space<vmem>>, vector<8x8xf32>
    tpu.vector_store %arg2[%c0_98, %c0_99], %265 {strides = array<i32>} : memref<8x8xf32, #tpu.memory_space<vmem>>, vector<8x8xf32>,
    return
  }
}

</mosaic_0001>

<bundles_post_ra>
// kernel: tpu_custom_call.1
= control target key start
LH: loop header
LB: loop body
LE: loop exit
PB: predicated region body
PF: predicated region fallthrough
CT: control target
= control target key end

     0   :  { %vm21_vm0 = vcmask 64512   ;;  %v1859_v2 = vmov 0.0   ;;  %vm1860_vm1 = vmmov 0   ;;  %s2163_s0 = inlined_call_operand.vmem [shape: f32[72,32], index: 0, kind: input, shape index: {}]   ;;  %s2164_s1 = inlined_call_operand.vmem [shape: f32[392,8], index: 1, kind: input, shape index: {}]   ;;  %s2165_s2 = inlined_call_operand.hbm [shape: f32[8,8], index: 2, kind: output, shape index: {}]  }
   0x1   :  { %v1881_v0 = vld [vmem:[%s2163_s0] sm:$0xff]  ;;  %1591 = vmatprep.subr.mxu1 %v1859_v2  ;;  %1593 = vmatprep.mubr.msk.f32.mxu1 %vm1860_vm1, %v1859_v2 }
   0x2   :  { %v13_v1 = vld [vmem:[%s2164_s1] sm:$0xff] }
   0x3   :  { %7 = vsyncpa [#allocation3], 0  ;;  %1592 = vmatpush3.msra.mxu1 %v1881_v0  ;;  %1607 = vmatprep.subr.mxu0 %v1859_v2  ;;  %v17_v3 = vld [vmem:[%s2164_s1 + $0x168] sm:$0xff]  ;;  %v18_v4 = vld [vmem:[%s2164_s1 + $0x170] sm:$0xff]  ;;  %v1861_v6 = vmov 0.0|0.0   ;;  %vm98_vm2 = vcmask 261120  }
   0x4   :  { %1594 = vmatmul.mubr.msk.f32.vlgmr.msra.gmra.mrb[0].mxu1 %vm21_vm0, %v13_v1  ;;  %1608 = vmatpush3.msra.mxu0 %v1881_v0  ;;  %v19_v5 = vld [vmem:[%s2164_s1 + $0x178] sm:$0xff]  ;;  %v1720_v7 = vpack.c.bf16 %v18_v4, %v17_v3  ;;  %v20_v8 = vld [vmem:[%s2164_s1 + $0x180] sm:$0xff]  ;;  %v205_v46 = vld [vmem:[%s2164_s1 + $0x148] sm:$0xff] }
   0x5   :  { %1604 = vmatprep.mubr.msk.f32.mxu1 %vm1860_vm1, %v1859_v2  ;;  %1609 = vmatprep.mubr.msk.f32.mxu0 %vm1860_vm1, %v1859_v2  ;;  %v1723_v9 = vpack.c.bf16 %v20_v8, %v19_v5  ;;  %v14_v10 = vld [vmem:[%s2163_s0 + $0x40] sm:$0xff]  ;;  %v206_v47 = vld [vmem:[%s2164_s1 + $0x150] sm:$0xff]  ;;  %v207_v48 = vld [vmem:[%s2164_s1 + $0x158] sm:$0xff] }
   0x6   :  { %1719 = vmatprep.subr.bf16.mxu1 %v1861_v6  ;;  %1725 = vmatprep.subr.bf16.mxu0 %v1861_v6  ;;  %v15_v15 = vld [vmem:[%s2164_s1 + $0x40] sm:$0xff]  ;;  %v1726_v49 = vpack.c.bf16 %v206_v47, %v205_v46  ;;  %v202_v52 = vld [vmem:[%s2163_s0 + $0x38] sm:$0xff] }
   0x7   :  { %1721 = vmatpush3.bf16.msra.mxu1 %v1720_v7  ;;  %v96_v16 = vmul.f32 %v15_v15, %v13_v1  ;;  %v16_v17 = vld [vmem:[%s2164_s1 + $0x80] sm:$0xff]  ;;  %v203_v57 = vld [vmem:[%s2164_s1 + $0x38] sm:$0xff] }
   0x8   :  { %1722 = vmatprep.subr.bf16.mxu1 %v1861_v6  ;;  %v208_v50 = vld [vmem:[%s2164_s1 + $0x160] sm:$0xff]  ;;  %v204_v59 = vld [vmem:[%s2164_s1 + $0x78] sm:$0xff] }
   0x9   :  { %v97_v18 = vadd.f32 %v96_v16, %v16_v17  ;;  %v1729_v51 = vpack.c.bf16 %v208_v50, %v207_v48 }
   0xb   :  { %1724 = vmatpush3.bf16.msra.mxu1 %v1723_v9 }
   0xc   :  { %1623 = vmatprep.subr.mxu1 %v1859_v2 }
  0xd7   :  { %v91_v11 = vpop.f32.mrb[0].mxu1 }
  0xd8   :  { %v92_v12 = vadd.f32 %v91_v11, %v14_v10  ;;  %v1595_v13 = vpop.f32.mrb[1].mxu1 }
  0xda   :  { %1803 = vtanh.f32 %v92_v12 }
  0xe4   :  { %v1804_v14 = vpop.eup %1803 }
  0xe5   :  { %1605 = vmatmul.mubr.msk.f32.vlgmr.msra.gmra.mrb[2].mxu1 %vm98_vm2, %v1804_v14 }
  0xe6   :  { %1624 = vmatpush3.msra.mxu1 %v1881_v0  ;;  %1625 = vmatprep.mubr.msk.f32.mxu1 %vm1860_vm1, %v1859_v2 }
  0xe7   :  { %1731 = vmatprep.subr.bf16.mxu1 %v1861_v6 }
 0x1b8   :  { %v168_v19 = vpop.f32.mrb[2].mxu1 }
 0x1b9   :  { %v172_v20 = vsub.f32 %v97_v18, %v168_v19  ;;  %v1606_v21 = vpop.f32.mrb[3].mxu1 }
 0x1bb   :  { %v173_v22 = vmin.f32 %v172_v20, 1.0 }
 0x1bd   :  { %vm174_vm3 = vcmp.lt.f32.partialorder %v173_v22, 0.0 }
 0x1be   :  { %v175_v23 = vsel %vm174_vm3, 1e-05, %v173_v22 }
 0x1bf   :  { %v176_v24 = vsel %vm21_vm0, %v175_v23, inf  ;;  %v187_v25 = vsel %vm21_vm0, %v175_v23, -inf }
 0x1c0   :  { %177 = vmin.xlane.f32.xlu0 %v176_v24 }
 0x1c4   :  { %188 = vmax.xlane.f32.xlu0 %v187_v25 }
 0x24d   :  { %v178_v26 = vpop.xlane.xlu0 %177 }
 0x24e   :  { %v179_v27 = vrot.slane %v178_v26, 4 }
 0x250   :  { %v180_v28 = vmin.f32 %v178_v26, %v179_v27  ;;  %v391_v27 = vld [vmem:[%s2164_s1 + $0x128] sm:$0xff] }
 0x251   :  { %v189_v29 = vpop.xlane.xlu0 %188 }
 0x252   :  { %v181_v30 = vrot.slane %v180_v28, 2  ;;  %v190_v31 = vrot.slane %v189_v29, 4 }
 0x254   :  { %v191_v32 = vmax.f32 %v189_v29, %v190_v31  ;;  %v182_v33 = vmin.f32 %v180_v28, %v181_v30  ;;  %v392_v28 = vld [vmem:[%s2164_s1 + $0x130] sm:$0xff]  ;;  %v393_v29 = vld [vmem:[%s2164_s1 + $0x138] sm:$0xff]  ;;  %v394_v31 = vld [vmem:[%s2164_s1 + $0x140] sm:$0xff] }
 0x255   :  { %v1732_v30 = vpack.c.bf16 %v392_v28, %v391_v27 }
 0x256   :  { %v192_v34 = vrot.slane %v191_v32, 2  ;;  %v183_v35 = vrot.slane %v182_v33, 1 }
 0x258   :  { %v184_v36 = vmin.f32 %v182_v33, %v183_v35  ;;  %v193_v37 = vmax.f32 %v191_v32, %v192_v34  ;;  %v1735_v32 = vpack.c.bf16 %v394_v31, %v393_v29  ;;  %v388_v33 = vld [vmem:[%s2163_s0 + $0x30] sm:$0xff] }
 0x25a   :  { %1767 = vpush %v184_v36  ;;  %v194_v38 = vrot.slane %v193_v37, 1 }
 0x25c   :  { %v195_v39 = vmax.f32 %v193_v37, %v194_v38  ;;  %v389_v38 = vld [vmem:[%s2164_s1 + $0x30] sm:$0xff] }
 0x25e   :  { %1769 = vpush %v195_v39 }
 0x28b   :  { %s1768_s27 = spop %1767 }
 0x28c   :  { %v186_v40 = vstv %s1768_s27  ;;  %s1862_s27 = smov [#allocation2]  }
 0x28d   :  { %v198_v43 = vsub.f32 %v175_v23, %v186_v40 }
 0x28f   :  { %s1770_s28 = spop %1769 }
 0x290   :  { %v197_v41 = vstv %s1770_s28  ;;  %s1511_s28 = sshll.u32 %s1862_s27, 4  ;;  %s1512_s28 = int_to_ptr.vmem [resolvable:$true] %s1511_s28 }
 0x291   :  { %v199_v42 = vsub.f32 %v197_v41, %v186_v40  ;;  %v390_v40 = vld [vmem:[%s2164_s1 + $0x70] sm:$0xff]  ;;  %s1835_s29 = scalar_lea.vmem %s1512_s28, 128  ;;  %p1840_p1 = scmp.lt.s32.totalorder %s1512_s28, %s1512_s28 }
 0x292   :  { %p1836_p0 = scmp.ne.s32.totalorder %s1512_s28, %s1835_s29  ;;  %p1841_p2 = scmp.lt.s32.totalorder %s1835_s29, %s1835_s29 }
 0x293   :  { %1805 = vrcp.f32 %v199_v42 }
 0x294   :  { %p1842_p3 = por %p1841_p2, %p1840_p1 }
 0x296   :  { %p1843_p4 = pnand %p1842_p3, %p1836_p0 }
 0x29d   :  { %v1806_v44 = vpop.eup %1805 }
 0x29e   :  { %v201_v45 = vmul.f32 %v1806_v44, %v198_v43 }
 0x2a0   :  { %1610 = vmatmul.mubr.msk.f32.vlgmr.msra.gmra.mrb[0].mxu0 %vm21_vm0, %v201_v45  ;;  %v283_v58 = vmul.f32 %v203_v57, %v201_v45 }
 0x2a1   :  { %1620 = vmatprep.mubr.msk.f32.mxu0 %vm1860_vm1, %v1859_v2  ;;  %1727 = vmatpush3.bf16.msra.mxu0 %v1726_v49 }
 0x2a2   :  { %1728 = vmatprep.subr.bf16.mxu0 %v1861_v6  ;;  %v284_v60 = vadd.f32 %v283_v58, %v204_v59 }
 0x2a5   :  { %1730 = vmatpush3.bf16.msra.mxu0 %v1729_v51 }
 0x2a6   :  { %1639 = vmatprep.subr.mxu0 %v1859_v2 }
 0x373   :  { %v278_v53 = vpop.f32.mrb[0].mxu0 }
 0x374   :  { %v279_v54 = vadd.f32 %v278_v53, %v202_v52  ;;  %v1611_v55 = vpop.f32.mrb[1].mxu0 }
 0x376   :  { %1807 = vtanh.f32 %v279_v54 }
 0x380   :  { %v1808_v56 = vpop.eup %1807 }
 0x381   :  { %1621 = vmatmul.mubr.msk.f32.vlgmr.msra.gmra.mrb[2].mxu0 %vm98_vm2, %v1808_v56 }
 0x382   :  { %1640 = vmatpush3.msra.mxu0 %v1881_v0  ;;  %1641 = vmatprep.mubr.msk.f32.mxu0 %vm1860_vm1, %v1859_v2 }
 0x383   :  { %1737 = vmatprep.subr.bf16.mxu0 %v1861_v6 }
 0x454   :  { %v354_v61 = vpop.f32.mrb[2].mxu0 }
 0x455   :  { %v358_v62 = vsub.f32 %v284_v60, %v354_v61  ;;  %v1622_v63 = vpop.f32.mrb[3].mxu0 }
 0x457   :  { %v359_v1 = vmin.f32 %v358_v62, 1.0 }
 0x459   :  { %vm360_vm4 = vcmp.lt.f32.partialorder %v359_v1, 0.0 }
 0x45a   :  { %v361_v3 = vsel %vm360_vm4, 1e-05, %v359_v1 }
 0x45b   :  { %v362_v4 = vsel %vm21_vm0, %v361_v3, inf  ;;  %v373_v5 = vsel %vm21_vm0, %v361_v3, -inf }
 0x45c   :  { %363 = vmin.xlane.f32.xlu1 %v362_v4 }
 0x460   :  { %374 = vmax.xlane.f32.xlu1 %v373_v5 }
 0x4e9   :  { %v364_v7 = vpop.xlane.xlu1 %363 }
 0x4ea   :  { %v365_v8 = vrot.slane %v364_v7, 4 }
 0x4ec   :  { %v366_v9 = vmin.f32 %v364_v7, %v365_v8  ;;  %v577_v8 = vld [vmem:[%s2164_s1 + $0x108] sm:$0xff] }
 0x4ed   :  { %v375_v10 = vpop.xlane.xlu1 %374 }
 0x4ee   :  { %v367_v11 = vrot.slane %v366_v9, 2  ;;  %v376_v12 = vrot.slane %v375_v10, 4 }
 0x4f0   :  { %v377_v13 = vmax.f32 %v375_v10, %v376_v12  ;;  %v368_v14 = vmin.f32 %v366_v9, %v367_v11  ;;  %v578_v9 = vld [vmem:[%s2164_s1 + $0x110] sm:$0xff]  ;;  %v579_v10 = vld [vmem:[%s2164_s1 + $0x118] sm:$0xff]  ;;  %v580_v12 = vld [vmem:[%s2164_s1 + $0x120] sm:$0xff] }
 0x4f1   :  { %v1738_v11 = vpack.c.bf16 %v578_v9, %v577_v8 }
 0x4f2   :  { %v378_v15 = vrot.slane %v377_v13, 2  ;;  %v369_v16 = vrot.slane %v368_v14, 1 }
 0x4f4   :  { %v370_v17 = vmin.f32 %v368_v14, %v369_v16  ;;  %v379_v18 = vmax.f32 %v377_v13, %v378_v15  ;;  %v1741_v13 = vpack.c.bf16 %v580_v12, %v579_v10  ;;  %v574_v14 = vld [vmem:[%s2163_s0 + $0x28] sm:$0xff] }
 0x4f6   :  { %1771 = vpush %v370_v17  ;;  %v380_v19 = vrot.slane %v379_v18, 1 }
 0x4f8   :  { %v381_v20 = vmax.f32 %v379_v18, %v380_v19  ;;  %v575_v19 = vld [vmem:[%s2164_s1 + $0x28] sm:$0xff] }
 0x4fa   :  { %1773 = vpush %v381_v20 }
 0x527   :  { %s1772_s15 = spop %1771 }
 0x528   :  { %v372_v21 = vstv %s1772_s15 }
 0x529   :  { %v384_v24 = vsub.f32 %v361_v3, %v372_v21 }
 0x52b   :  { %s1774_s16 = spop %1773 }
 0x52c   :  { %v383_v22 = vstv %s1774_s16 }
 0x52d   :  { %v385_v23 = vsub.f32 %v383_v22, %v372_v21  ;;  %v576_v21 = vld [vmem:[%s2164_s1 + $0x68] sm:$0xff] }
 0x52f   :  { %1809 = vrcp.f32 %v385_v23 }
 0x539   :  { %v1810_v25 = vpop.eup %1809 }
 0x53a   :  { %v387_v26 = vmul.f32 %v1810_v25, %v384_v24 }
 0x53c   :  { %1626 = vmatmul.mubr.msk.f32.vlgmr.msra.gmra.mrb[4].mxu1 %vm21_vm0, %v387_v26  ;;  %v469_v39 = vmul.f32 %v389_v38, %v387_v26 }
 0x53d   :  { %1636 = vmatprep.mubr.msk.f32.mxu1 %vm1860_vm1, %v1859_v2  ;;  %1733 = vmatpush3.bf16.msra.mxu1 %v1732_v30 }
 0x53e   :  { %1734 = vmatprep.subr.bf16.mxu1 %v1861_v6  ;;  %v470_v41 = vadd.f32 %v469_v39, %v390_v40 }
 0x541   :  { %1736 = vmatpush3.bf16.msra.mxu1 %v1735_v32 }
 0x542   :  { %1655 = vmatprep.subr.mxu1 %v1859_v2 }
 0x60f   :  { %v464_v34 = vpop.f32.mrb[4].mxu1 }
 0x610   :  { %v465_v35 = vadd.f32 %v464_v34, %v388_v33  ;;  %v1627_v36 = vpop.f32.mrb[5].mxu1 }
 0x612   :  { %1811 = vtanh.f32 %v465_v35 }
 0x61c   :  { %v1812_v37 = vpop.eup %1811 }
 0x61d   :  { %1637 = vmatmul.mubr.msk.f32.vlgmr.msra.gmra.mrb[6].mxu1 %vm98_vm2, %v1812_v37 }
 0x61e   :  { %1656 = vmatpush3.msra.mxu1 %v1881_v0  ;;  %1657 = vmatprep.mubr.msk.f32.mxu1 %vm1860_vm1, %v1859_v2 }
 0x61f   :  { %1743 = vmatprep.subr.bf16.mxu1 %v1861_v6 }
 0x6f0   :  { %v540_v42 = vpop.f32.mrb[6].mxu1 }
 0x6f1   :  { %v544_v43 = vsub.f32 %v470_v41, %v540_v42  ;;  %v1638_v44 = vpop.f32.mrb[7].mxu1 }
 0x6f3   :  { %v545_v45 = vmin.f32 %v544_v43, 1.0 }
 0x6f5   :  { %vm546_vm5 = vcmp.lt.f32.partialorder %v545_v45, 0.0 }
 0x6f6   :  { %v547_v46 = vsel %vm546_vm5, 1e-05, %v545_v45 }
 0x6f7   :  { %v559_v47 = vsel %vm21_vm0, %v547_v46, -inf  ;;  %v548_v48 = vsel %vm21_vm0, %v547_v46, inf }
 0x6f8   :  { %560 = vmax.xlane.f32.xlu1 %v559_v47  ;;  %549 = vmin.xlane.f32.xlu0 %v548_v48 }
 0x785   :  { %v561_v49 = vpop.xlane.xlu1 %560  ;;  %v550_v50 = vpop.xlane.xlu0 %549 }
 0x786   :  { %v562_v51 = vrot.slane %v561_v49, 4  ;;  %v551_v52 = vrot.slane %v550_v50, 4 }
 0x788   :  { %v563_v53 = vmax.f32 %v561_v49, %v562_v51  ;;  %v552_v54 = vmin.f32 %v550_v50, %v551_v52  ;;  %v763_v50 = vld [vmem:[%s2164_s1 + $0xe8] sm:$0xff]  ;;  %v764_v51 = vld [vmem:[%s2164_s1 + $0xf0] sm:$0xff]  ;;  %v765_v52 = vld [vmem:[%s2164_s1 + $0xf8] sm:$0xff] }
 0x78a   :  { %v564_v55 = vrot.slane %v563_v53, 2  ;;  %v553_v56 = vrot.slane %v552_v54, 2 }
 0x78c   :  { %v554_v57 = vmin.f32 %v552_v54, %v553_v56  ;;  %v565_v58 = vmax.f32 %v563_v53, %v564_v55  ;;  %v1744_v53 = vpack.c.bf16 %v764_v51, %v763_v50  ;;  %v766_v54 = vld [vmem:[%s2164_s1 + $0x100] sm:$0xff] }
 0x78d   :  { %v1747_v55 = vpack.c.bf16 %v766_v54, %v765_v52  ;;  %v760_v56 = vld [vmem:[%s2163_s0 + $0x20] sm:$0xff] }
 0x78e   :  { %v555_v59 = vrot.slane %v554_v57, 1  ;;  %v566_v60 = vrot.slane %v565_v58, 1 }
 0x790   :  { %v556_v61 = vmin.f32 %v554_v57, %v555_v59  ;;  %v567_v62 = vmax.f32 %v565_v58, %v566_v60 }
 0x792   :  { %1775 = vpush %v556_v61  ;;  %v761_v61 = vld [vmem:[%s2164_s1 + $0x20] sm:$0xff] }
 0x793   :  { %1777 = vpush %v567_v62 }
 0x7c3   :  { %s1776_s3 = spop %1775 }
 0x7c4   :  { %v558_v63 = vstv %s1776_s3  ;;  %s1778_s4 = spop %1777 }
 0x7c5   :  { %v569_v1 = vstv %s1778_s4  ;;  %v570_v4 = vsub.f32 %v547_v46, %v558_v63 }
 0x7c6   :  { %v571_v3 = vsub.f32 %v569_v1, %v558_v63  ;;  %v762_v63 = vld [vmem:[%s2164_s1 + $0x60] sm:$0xff] }
 0x7c8   :  { %1813 = vrcp.f32 %v571_v3 }
 0x7d2   :  { %v1814_v5 = vpop.eup %1813 }
 0x7d3   :  { %v573_v7 = vmul.f32 %v1814_v5, %v570_v4 }
 0x7d5   :  { %1642 = vmatmul.mubr.msk.f32.vlgmr.msra.gmra.mrb[4].mxu0 %vm21_vm0, %v573_v7  ;;  %v655_v20 = vmul.f32 %v575_v19, %v573_v7 }
 0x7d6   :  { %1652 = vmatprep.mubr.msk.f32.mxu0 %vm1860_vm1, %v1859_v2  ;;  %1739 = vmatpush3.bf16.msra.mxu0 %v1738_v11 }
 0x7d7   :  { %1740 = vmatprep.subr.bf16.mxu0 %v1861_v6  ;;  %v656_v22 = vadd.f32 %v655_v20, %v576_v21 }
 0x7da   :  { %1742 = vmatpush3.bf16.msra.mxu0 %v1741_v13 }
 0x7db   :  { %1671 = vmatprep.subr.mxu0 %v1859_v2 }
 0x8a8   :  { %v650_v15 = vpop.f32.mrb[4].mxu0 }
 0x8a9   :  { %v651_v16 = vadd.f32 %v650_v15, %v574_v14  ;;  %v1643_v17 = vpop.f32.mrb[5].mxu0 }
 0x8ab   :  { %1815 = vtanh.f32 %v651_v16 }
 0x8b5   :  { %v1816_v18 = vpop.eup %1815 }
 0x8b6   :  { %1653 = vmatmul.mubr.msk.f32.vlgmr.msra.gmra.mrb[6].mxu0 %vm98_vm2, %v1816_v18 }
 0x8b7   :  { %1672 = vmatpush3.msra.mxu0 %v1881_v0  ;;  %1673 = vmatprep.mubr.msk.f32.mxu0 %vm1860_vm1, %v1859_v2 }
 0x8b8   :  { %1749 = vmatprep.subr.bf16.mxu0 %v1861_v6 }
 0x989   :  { %v726_v23 = vpop.f32.mrb[6].mxu0 }
 0x98a   :  { %v730_v24 = vsub.f32 %v656_v22, %v726_v23  ;;  %v1654_v25 = vpop.f32.mrb[7].mxu0 }
 0x98c   :  { %v731_v26 = vmin.f32 %v730_v24, 1.0 }
 0x98e   :  { %vm732_vm6 = vcmp.lt.f32.partialorder %v731_v26, 0.0 }
 0x98f   :  { %v733_v27 = vsel %vm732_vm6, 1e-05, %v731_v26 }
 0x990   :  { %v745_v28 = vsel %vm21_vm0, %v733_v27, -inf  ;;  %v734_v29 = vsel %vm21_vm0, %v733_v27, inf }
 0x991   :  { %746 = vmax.xlane.f32.xlu1 %v745_v28  ;;  %735 = vmin.xlane.f32.xlu0 %v734_v29 }
 0xa1e   :  { %v747_v30 = vpop.xlane.xlu1 %746  ;;  %v736_v31 = vpop.xlane.xlu0 %735 }
 0xa1f   :  { %v748_v32 = vrot.slane %v747_v30, 4  ;;  %v737_v33 = vrot.slane %v736_v31, 4 }
 0xa21   :  { %v749_v34 = vmax.f32 %v747_v30, %v748_v32  ;;  %v738_v35 = vmin.f32 %v736_v31, %v737_v33  ;;  %v949_v31 = vld [vmem:[%s2164_s1 + $0xc8] sm:$0xff]  ;;  %v950_v32 = vld [vmem:[%s2164_s1 + $0xd0] sm:$0xff]  ;;  %v951_v33 = vld [vmem:[%s2164_s1 + $0xd8] sm:$0xff] }
 0xa23   :  { %v750_v36 = vrot.slane %v749_v34, 2  ;;  %v739_v37 = vrot.slane %v738_v35, 2 }
 0xa25   :  { %v740_v38 = vmin.f32 %v738_v35, %v739_v37  ;;  %v751_v39 = vmax.f32 %v749_v34, %v750_v36  ;;  %v1750_v34 = vpack.c.bf16 %v950_v32, %v949_v31  ;;  %v952_v35 = vld [vmem:[%s2164_s1 + $0xe0] sm:$0xff]  ;;  %v946_v37 = vld [vmem:[%s2163_s0 + $0x18] sm:$0xff] }
 0xa26   :  { %v1753_v36 = vpack.c.bf16 %v952_v35, %v951_v33 }
 0xa27   :  { %v741_v40 = vrot.slane %v740_v38, 1  ;;  %v752_v41 = vrot.slane %v751_v39, 1 }
 0xa29   :  { %v742_v42 = vmin.f32 %v740_v38, %v741_v40  ;;  %v753_v43 = vmax.f32 %v751_v39, %v752_v41 }
 0xa2b   :  { %1779 = vpush %v742_v42  ;;  %v947_v42 = vld [vmem:[%s2164_s1 + $0x18] sm:$0xff] }
 0xa2c   :  { %1781 = vpush %v753_v43 }
 0xa5c   :  { %s1780_s19 = spop %1779 }
 0xa5d   :  { %v744_v44 = vstv %s1780_s19  ;;  %s1782_s20 = spop %1781 }
 0xa5e   :  { %v755_v45 = vstv %s1782_s20  ;;  %v756_v47 = vsub.f32 %v733_v27, %v744_v44 }
 0xa5f   :  { %v757_v46 = vsub.f32 %v755_v45, %v744_v44  ;;  %v948_v44 = vld [vmem:[%s2164_s1 + $0x58] sm:$0xff] }
 0xa61   :  { %1817 = vrcp.f32 %v757_v46 }
 0xa6b   :  { %v1818_v48 = vpop.eup %1817 }
 0xa6c   :  { %v759_v49 = vmul.f32 %v1818_v48, %v756_v47 }
 0xa6e   :  { %1658 = vmatmul.mubr.msk.f32.vlgmr.msra.gmra.mrb[8].mxu1 %vm21_vm0, %v759_v49  ;;  %v841_v62 = vmul.f32 %v761_v61, %v759_v49 }
 0xa6f   :  { %1668 = vmatprep.mubr.msk.f32.mxu1 %vm1860_vm1, %v1859_v2  ;;  %1745 = vmatpush3.bf16.msra.mxu1 %v1744_v53 }
 0xa70   :  { %1746 = vmatprep.subr.bf16.mxu1 %v1861_v6  ;;  %v842_v1 = vadd.f32 %v841_v62, %v762_v63 }
 0xa73   :  { %1748 = vmatpush3.bf16.msra.mxu1 %v1747_v55 }
 0xa74   :  { %1687 = vmatprep.subr.mxu1 %v1859_v2 }
 0xb41   :  { %v836_v57 = vpop.f32.mrb[8].mxu1 }
 0xb42   :  { %v837_v58 = vadd.f32 %v836_v57, %v760_v56  ;;  %v1659_v59 = vpop.f32.mrb[9].mxu1 }
 0xb44   :  { %1819 = vtanh.f32 %v837_v58 }
 0xb4e   :  { %v1820_v60 = vpop.eup %1819 }
 0xb4f   :  { %1669 = vmatmul.mubr.msk.f32.vlgmr.msra.gmra.mrb[10].mxu1 %vm98_vm2, %v1820_v60 }
 0xb50   :  { %1688 = vmatpush3.msra.mxu1 %v1881_v0  ;;  %1689 = vmatprep.mubr.msk.f32.mxu1 %vm1860_vm1, %v1859_v2 }
 0xb51   :  { %1755 = vmatprep.subr.bf16.mxu1 %v1861_v6 }
 0xc22   :  { %v912_v3 = vpop.f32.mrb[10].mxu1 }
 0xc23   :  { %v916_v4 = vsub.f32 %v842_v1, %v912_v3  ;;  %v1670_v5 = vpop.f32.mrb[11].mxu1 }
 0xc25   :  { %v917_v7 = vmin.f32 %v916_v4, 1.0 }
 0xc27   :  { %vm918_vm7 = vcmp.lt.f32.partialorder %v917_v7, 0.0 }
 0xc28   :  { %v919_v8 = vsel %vm918_vm7, 1e-05, %v917_v7 }
 0xc29   :  { %v931_v9 = vsel %vm21_vm0, %v919_v8, -inf  ;;  %v920_v10 = vsel %vm21_vm0, %v919_v8, inf }
 0xc2a   :  { %932 = vmax.xlane.f32.xlu1 %v931_v9  ;;  %921 = vmin.xlane.f32.xlu0 %v920_v10 }
 0xcb7   :  { %v933_v11 = vpop.xlane.xlu1 %932  ;;  %v922_v12 = vpop.xlane.xlu0 %921 }
 0xcb8   :  { %v934_v13 = vrot.slane %v933_v11, 4  ;;  %v923_v14 = vrot.slane %v922_v12, 4 }
 0xcba   :  { %v935_v15 = vmax.f32 %v933_v11, %v934_v13  ;;  %v924_v16 = vmin.f32 %v922_v12, %v923_v14  ;;  %v1135_v11 = vld [vmem:[%s2164_s1 + $0xa8] sm:$0xff]  ;;  %v1136_v12 = vld [vmem:[%s2164_s1 + $0xb0] sm:$0xff]  ;;  %v1137_v13 = vld [vmem:[%s2164_s1 + $0xb8] sm:$0xff] }
 0xcbb   :  { %v1756_v14 = vpack.c.bf16 %v1136_v12, %v1135_v11 }
 0xcbc   :  { %v936_v17 = vrot.slane %v935_v15, 2  ;;  %v925_v18 = vrot.slane %v924_v16, 2 }
 0xcbe   :  { %v926_v19 = vmin.f32 %v924_v16, %v925_v18  ;;  %v937_v20 = vmax.f32 %v935_v15, %v936_v17  ;;  %v1138_v15 = vld [vmem:[%s2164_s1 + $0xc0] sm:$0xff]  ;;  %v1132_v17 = vld [vmem:[%s2163_s0 + $0x10] sm:$0xff] }
 0xcbf   :  { %v1759_v16 = vpack.c.bf16 %v1138_v15, %v1137_v13 }
 0xcc0   :  { %v927_v21 = vrot.slane %v926_v19, 1  ;;  %v938_v22 = vrot.slane %v937_v20, 1 }
 0xcc2   :  { %v928_v23 = vmin.f32 %v926_v19, %v927_v21  ;;  %v939_v24 = vmax.f32 %v937_v20, %v938_v22  ;;  %v1133_v22 = vld [vmem:[%s2164_s1 + $0x10] sm:$0xff] }
 0xcc4   :  { %1783 = vpush %v928_v23 }
 0xcc5   :  { %1785 = vpush %v939_v24  ;;  %v1134_v24 = vld [vmem:[%s2164_s1 + $0x50] sm:$0xff] }
 0xcf5   :  { %s1784_s7 = spop %1783 }
 0xcf6   :  { %v930_v25 = vstv %s1784_s7  ;;  %s1786_s8 = spop %1785 }
 0xcf7   :  { %v941_v26 = vstv %s1786_s8  ;;  %v942_v28 = vsub.f32 %v919_v8, %v930_v25 }
 0xcf8   :  { %v943_v27 = vsub.f32 %v941_v26, %v930_v25 }
 0xcfa   :  { %1821 = vrcp.f32 %v943_v27 }
 0xd04   :  { %v1822_v29 = vpop.eup %1821 }
 0xd05   :  { %v945_v30 = vmul.f32 %v1822_v29, %v942_v28 }
 0xd07   :  { %1674 = vmatmul.mubr.msk.f32.vlgmr.msra.gmra.mrb[8].mxu0 %vm21_vm0, %v945_v30  ;;  %v1027_v43 = vmul.f32 %v947_v42, %v945_v30 }
 0xd08   :  { %1684 = vmatprep.mubr.msk.f32.mxu0 %vm1860_vm1, %v1859_v2  ;;  %1751 = vmatpush3.bf16.msra.mxu0 %v1750_v34 }
 0xd09   :  { %1752 = vmatprep.subr.bf16.mxu0 %v1861_v6  ;;  %v1028_v45 = vadd.f32 %v1027_v43, %v948_v44 }
 0xd0c   :  { %1754 = vmatpush3.bf16.msra.mxu0 %v1753_v36 }
 0xd0d   :  { %1703 = vmatprep.subr.mxu0 %v1859_v2 }
 0xdda   :  { %v1022_v38 = vpop.f32.mrb[8].mxu0 }
 0xddb   :  { %v1023_v39 = vadd.f32 %v1022_v38, %v946_v37  ;;  %v1675_v40 = vpop.f32.mrb[9].mxu0 }
 0xddd   :  { %1823 = vtanh.f32 %v1023_v39 }
 0xde7   :  { %v1824_v41 = vpop.eup %1823 }
 0xde8   :  { %1685 = vmatmul.mubr.msk.f32.vlgmr.msra.gmra.mrb[10].mxu0 %vm98_vm2, %v1824_v41 }
 0xde9   :  { %1704 = vmatpush3.msra.mxu0 %v1881_v0  ;;  %1705 = vmatprep.mubr.msk.f32.mxu0 %vm1860_vm1, %v1859_v2 }
 0xdea   :  { %1761 = vmatprep.subr.bf16.mxu0 %v1861_v6 }
 0xebb   :  { %v1098_v46 = vpop.f32.mrb[10].mxu0 }
 0xebc   :  { %v1102_v47 = vsub.f32 %v1028_v45, %v1098_v46  ;;  %v1686_v48 = vpop.f32.mrb[11].mxu0 }
 0xebe   :  { %v1103_v49 = vmin.f32 %v1102_v47, 1.0 }
 0xec0   :  { %vm1104_vm8 = vcmp.lt.f32.partialorder %v1103_v49, 0.0 }
 0xec1   :  { %v1105_v0 = vsel %vm1104_vm8, 1e-05, %v1103_v49 }
 0xec2   :  { %v1117_v50 = vsel %vm21_vm0, %v1105_v0, -inf  ;;  %v1106_v51 = vsel %vm21_vm0, %v1105_v0, inf }
 0xec3   :  { %1118 = vmax.xlane.f32.xlu1 %v1117_v50  ;;  %1107 = vmin.xlane.f32.xlu0 %v1106_v51 }
 0xf50   :  { %v1119_v52 = vpop.xlane.xlu1 %1118  ;;  %v1108_v53 = vpop.xlane.xlu0 %1107 }
 0xf51   :  { %v1120_v54 = vrot.slane %v1119_v52, 4  ;;  %v1109_v55 = vrot.slane %v1108_v53, 4 }
 0xf53   :  { %v1121_v56 = vmax.f32 %v1119_v52, %v1120_v54  ;;  %v1110_v57 = vmin.f32 %v1108_v53, %v1109_v55  ;;  %v1321_v52 = vld [vmem:[%s2164_s1 + $0x88] sm:$0xff]  ;;  %v1322_v53 = vld [vmem:[%s2164_s1 + $0x90] sm:$0xff]  ;;  %v1323_v54 = vld [vmem:[%s2164_s1 + $0x98] sm:$0xff] }
 0xf54   :  { %v1762_v55 = vpack.c.bf16 %v1322_v53, %v1321_v52 }
 0xf55   :  { %v1122_v58 = vrot.slane %v1121_v56, 2  ;;  %v1111_v59 = vrot.slane %v1110_v57, 2 }
 0xf57   :  { %v1112_v60 = vmin.f32 %v1110_v57, %v1111_v59  ;;  %v1123_v61 = vmax.f32 %v1121_v56, %v1122_v58  ;;  %v1324_v56 = vld [vmem:[%s2164_s1 + $0xa0] sm:$0xff] }
 0xf58   :  { %v1765_v57 = vpack.c.bf16 %v1324_v56, %v1323_v54 }
 0xf59   :  { %v1113_v62 = vrot.slane %v1112_v60, 1  ;;  %v1124_v63 = vrot.slane %v1123_v61, 1 }
 0xf5b   :  { %v1114_v1 = vmin.f32 %v1112_v60, %v1113_v62  ;;  %v1125_v3 = vmax.f32 %v1123_v61, %v1124_v63  ;;  %v1319_v62 = vld [vmem:[%s2164_s1 + $0x8] sm:$0xff] }
 0xf5d   :  { %1787 = vpush %v1114_v1 }
 0xf5e   :  { %1789 = vpush %v1125_v3 }
 0xf8e   :  { %s1788_s23 = spop %1787 }
 0xf8f   :  { %v1116_v4 = vstv %s1788_s23  ;;  %s1790_s24 = spop %1789 }
 0xf90   :  { %v1127_v5 = vstv %s1790_s24  ;;  %v1128_v8 = vsub.f32 %v1105_v0, %v1116_v4 }
 0xf91   :  { %v1129_v7 = vsub.f32 %v1127_v5, %v1116_v4 }
 0xf93   :  { %1825 = vrcp.f32 %v1129_v7 }
 0xf9d   :  { %v1826_v9 = vpop.eup %1825 }
 0xf9e   :  { %v1131_v10 = vmul.f32 %v1826_v9, %v1128_v8 }
 0xfa0   :  { %1690 = vmatmul.mubr.msk.f32.vlgmr.msra.gmra.mrb[12].mxu1 %vm21_vm0, %v1131_v10  ;;  %v1213_v23 = vmul.f32 %v1133_v22, %v1131_v10 }
 0xfa1   :  { %1700 = vmatprep.mubr.msk.f32.mxu1 %vm1860_vm1, %v1859_v2  ;;  %1757 = vmatpush3.bf16.msra.mxu1 %v1756_v14 }
 0xfa2   :  { %1758 = vmatprep.subr.bf16.mxu1 %v1861_v6  ;;  %v1214_v25 = vadd.f32 %v1213_v23, %v1134_v24 }
 0xfa5   :  { %1760 = vmatpush3.bf16.msra.mxu1 %v1759_v16 }
0x1073   :  { %v1208_v18 = vpop.f32.mrb[12].mxu1 }
0x1074   :  { %v1209_v19 = vadd.f32 %v1208_v18, %v1132_v17  ;;  %v1691_v20 = vpop.f32.mrb[13].mxu1 }
0x1076   :  { %1827 = vtanh.f32 %v1209_v19 }
0x1080   :  { %v1828_v21 = vpop.eup %1827 }
0x1081   :  { %1701 = vmatmul.mubr.msk.f32.vlgmr.msra.gmra.mrb[14].mxu1 %vm98_vm2, %v1828_v21 }
0x1154   :  { %v1284_v26 = vpop.f32.mrb[14].mxu1 }
0x1155   :  { %v1288_v27 = vsub.f32 %v1214_v25, %v1284_v26  ;;  %v1702_v28 = vpop.f32.mrb[15].mxu1 }
0x1157   :  { %v1289_v29 = vmin.f32 %v1288_v27, 1.0 }
0x1159   :  { %vm1290_vm9 = vcmp.lt.f32.partialorder %v1289_v29, 0.0 }
0x115a   :  { %v1291_v30 = vsel %vm1290_vm9, 1e-05, %v1289_v29 }
0x115b   :  { %v1303_v31 = vsel %vm21_vm0, %v1291_v30, -inf  ;;  %v1292_v32 = vsel %vm21_vm0, %v1291_v30, inf }
0x115c   :  { %1304 = vmax.xlane.f32.xlu1 %v1303_v31  ;;  %1293 = vmin.xlane.f32.xlu0 %v1292_v32 }
0x11e9   :  { %v1305_v33 = vpop.xlane.xlu1 %1304  ;;  %v1294_v34 = vpop.xlane.xlu0 %1293 }
0x11ea   :  { %v1306_v35 = vrot.slane %v1305_v33, 4  ;;  %v1295_v36 = vrot.slane %v1294_v34, 4 }
0x11ec   :  { %v1307_v37 = vmax.f32 %v1305_v33, %v1306_v35  ;;  %v1296_v38 = vmin.f32 %v1294_v34, %v1295_v36 }
0x11ee   :  { %v1308_v39 = vrot.slane %v1307_v37, 2  ;;  %v1297_v40 = vrot.slane %v1296_v38, 2 }
0x11f0   :  { %v1298_v41 = vmin.f32 %v1296_v38, %v1297_v40  ;;  %v1309_v42 = vmax.f32 %v1307_v37, %v1308_v39 }
0x11f2   :  { %v1299_v43 = vrot.slane %v1298_v41, 1  ;;  %v1310_v44 = vrot.slane %v1309_v42, 1 }
0x11f4   :  { %v1300_v45 = vmin.f32 %v1298_v41, %v1299_v43  ;;  %v1311_v46 = vmax.f32 %v1309_v42, %v1310_v44 }
0x11f6   :  { %1791 = vpush %v1300_v45 }
0x11f7   :  { %1793 = vpush %v1311_v46 }
0x1227   :  { %s1792_s11 = spop %1791 }
0x1228   :  { %v1302_v47 = vstv %s1792_s11  ;;  %s1794_s12 = spop %1793 }
0x1229   :  { %v1313_v48 = vstv %s1794_s12  ;;  %v1314_v0 = vsub.f32 %v1291_v30, %v1302_v47 }
0x122a   :  { %v1315_v49 = vsub.f32 %v1313_v48, %v1302_v47 }
0x122c   :  { %1829 = vrcp.f32 %v1315_v49 }
0x1236   :  { %v1830_v50 = vpop.eup %1829 }
0x1237   :  { %v1317_v51 = vmul.f32 %v1830_v50, %v1314_v0 }
0x1239   :  { %1706 = vmatmul.mubr.msk.f32.vlgmr.msra.gmra.mrb[12].mxu0 %vm21_vm0, %v1317_v51  ;;  %v1399_v63 = vmul.f32 %v1319_v62, %v1317_v51 }
0x123a   :  { %1716 = vmatprep.mubr.msk.f32.mxu0 %vm1860_vm1, %v1859_v2  ;;  %1763 = vmatpush3.bf16.msra.mxu0 %v1762_v55  ;;  %v1318_v2 = vld [vmem:[%s2163_s0 + $0x8] sm:$0xff] }
0x123b   :  { %1764 = vmatprep.subr.bf16.mxu0 %v1861_v6  ;;  %v1320_v6 = vld [vmem:[%s2164_s1 + $0x48] sm:$0xff] }
0x123c   :  { %v1400_v1 = vadd.f32 %v1399_v63, %v1320_v6 }
0x123e   :  { %1766 = vmatpush3.bf16.msra.mxu0 %v1765_v57 }
0x130c   :  { %v1394_v58 = vpop.f32.mrb[12].mxu0 }
0x130d   :  { %v1395_v59 = vadd.f32 %v1394_v58, %v1318_v2  ;;  %v1707_v60 = vpop.f32.mrb[13].mxu0 }
0x130f   :  { %1831 = vtanh.f32 %v1395_v59 }
0x1319   :  { %v1832_v61 = vpop.eup %1831 }
0x131a   :  { %1717 = vmatmul.mubr.msk.f32.vlgmr.msra.gmra.mrb[14].mxu0 %vm98_vm2, %v1832_v61 }
0x13ed   :  { %v1470_v3 = vpop.f32.mrb[14].mxu0 }
0x13ee   :  { %v1474_v4 = vsub.f32 %v1400_v1, %v1470_v3  ;;  %v1718_v5 = vpop.f32.mrb[15].mxu0 }
0x13f0   :  { %v1475_v7 = vmin.f32 %v1474_v4, 1.0 }
0x13f2   :  { %vm1476_vm10 = vcmp.lt.f32.partialorder %v1475_v7, 0.0 }
0x13f3   :  { %v1477_v8 = vsel %vm1476_vm10, 1e-05, %v1475_v7 }
0x13f4   :  { %v1489_v9 = vsel %vm21_vm0, %v1477_v8, -inf  ;;  %v1478_v10 = vsel %vm21_vm0, %v1477_v8, inf }
0x13f5   :  { %1490 = vmax.xlane.f32.xlu1 %v1489_v9  ;;  %1479 = vmin.xlane.f32.xlu0 %v1478_v10 }
0x1482   :  { %v1491_v11 = vpop.xlane.xlu1 %1490  ;;  %v1480_v12 = vpop.xlane.xlu0 %1479 }
0x1483   :  { %v1492_v13 = vrot.slane %v1491_v11, 4  ;;  %v1481_v14 = vrot.slane %v1480_v12, 4 }
0x1485   :  { %v1493_v15 = vmax.f32 %v1491_v11, %v1492_v13  ;;  %v1482_v16 = vmin.f32 %v1480_v12, %v1481_v14 }
0x1487   :  { %v1494_v17 = vrot.slane %v1493_v15, 2  ;;  %v1483_v18 = vrot.slane %v1482_v16, 2 }
0x1489   :  { %v1495_v19 = vmax.f32 %v1493_v15, %v1494_v17  ;;  %v1484_v20 = vmin.f32 %v1482_v16, %v1483_v18 }
0x148b   :  { %v1485_v21 = vrot.slane %v1484_v20, 1  ;;  %v1496_v22 = vrot.slane %v1495_v19, 1 }
0x148d   :  { %v1486_v23 = vmin.f32 %v1484_v20, %v1485_v21  ;;  %v1497_v24 = vmax.f32 %v1495_v19, %v1496_v22 }
0x148f   :  { %1795 = vpush %v1486_v23 }
0x1490   :  { %1797 = vpush %v1497_v24 }
0x14c0   :  { %s1796_s0 = spop %1795 }
0x14c1   :  { %v1488_v25 = vstv %s1796_s0  ;;  %s1798_s1 = spop %1797 }
0x14c2   :  { %v1499_v26 = vstv %s1798_s1  ;;  %v1500_v28 = vsub.f32 %v1477_v8, %v1488_v25 }
0x14c3   :  { %v1501_v27 = vsub.f32 %v1499_v26, %v1488_v25 }
0x14c5   :  { %1833 = vrcp.f32 %v1501_v27 }
0x14cf   :  { %v1834_v29 = vpop.eup %1833 }
0x14d0   :  { %v1503_v30 = vmul.f32 %v1834_v29, %v1500_v28 }
0x14d2   :  { %1504 = vst.msk [vmem:[#allocation2] sm:$0xff] %vm21_vm0, %v1503_v30 }
0x14d3   :  { %1846 = shalt.err (!%p1843_p4)
}
0x14d4   :  { %s1847_s4 = scalar_lea.hbm %s2165_s2, 128 }
0x14d5   :  { %p1848_p5 = scmp.ne.s32.totalorder %s2165_s2, %s1847_s4  ;;  %p1851_p6 = scmp.lt.u32.totalorder %s1847_s4, %s2165_s2 }
0x14d7   :  { %p1853_p7 = pnand %p1851_p6, %p1848_p5 }
0x14d9   :  { %1856 = shalt.err (!%p1853_p7)
}
0x14da   :  { %1514 = dma.vmem_to_hbm [thread:$0]  %s1512_s28, 128, %s2165_s2, [#allocation3]  }
0x14db   :  { %1857 = dma.done.wait [#allocation3], 128  }
0x14dc   :  { %1858 = vsyncadd [#allocation3], 4294967168 }
0x14dd   :  { %1518 = vsyncpa [#allocation3], 1 }

</bundles_post_ra>
